<compile_context>
chip_gen: v7x
topology: tpu7x:2x2x1
jax: 0.10.0
libtpu: 0.0.40
codegen_flags: <defaults>
</compile_context>

<pallas_src>
import functools
import math

import jax
import jax.numpy as jnp
from jax import lax
from jax.experimental import pallas as pl
from jax.experimental.pallas import tpu as pltpu

LANES = 128
SUBLANES = 8
ROW_ALIGN = 16  # pad rows to a multiple of 16 so bf16 (16,128) tiling also works


def _chip_defaults():
    """Return (num_cores_outer_axis, tile_rows) based on the attached chip."""
    kind = ""
    try:
        kind = (jax.devices()[0].device_kind or "").lower()
    except Exception:  # defensive: fall back to safe single-core defaults
        pass
    if "v7" in kind or "tpu7" in kind or "7x" in kind:
        # v7x: 2 TensorCores/chip, ~3.2 TB/s HBM -> 4 MiB input blocks amortize
        # per-grid-step overhead; 2 inputs x 2 buffers ~= 16 MiB VMEM (of 64).
        return 2, 8192
    # v5e / v6e: single TensorCore; 2 MiB blocks are already ~85% of roofline.
    return 1, 4096


def _wing_loss_kernel(pred_ref, tgt_ref, out_ref, *,
                      w, inv_eps, c, rows, num_blocks, steps_per_core,
                      tile_rows, needs_mask):
    step = pl.program_id(1)

    # Zero the per-core (1, 8, 128) resident output accumulator at pass start.
    @pl.when(step == 0)
    def _():
        out_ref[...] = jnp.zeros_like(out_ref)

    def loss_of(d):
        abs_d = jnp.abs(d)
        wing = w * jnp.log(1.0 + abs_d * inv_eps)       # log -> EUP slot
        return jnp.where(abs_d < w, wing, abs_d - c)    # select -> VPU

    def accumulate(loss):
        # Fold (tile, 128) -> (8, 128) with vreg-aligned VPU adds, then one
        # tiny read-modify-write of the resident output block.
        partial = loss.reshape(tile_rows // SUBLANES, SUBLANES, LANES).sum(axis=0)
        out_ref[0] += partial

    d = pred_ref[...].astype(jnp.float32) - tgt_ref[...].astype(jnp.float32)

    if needs_mask:
        logical_block = pl.program_id(0) * steps_per_core + step

        # Hot path: every block except the (possibly partial) last / any
        # clamped duplicate block accumulates unmasked.
        @pl.when(logical_block < num_blocks - 1)
        def _():
            accumulate(loss_of(d))

        # Tail path: partial last block and fully-out-of-range duplicate
        # blocks (logical_block >= num_blocks).  Select (not multiply) so
        # NaN/Inf garbage in out-of-range rows cannot propagate.
        @pl.when(logical_block >= num_blocks - 1)
        def _():
            row_ids = logical_block * tile_rows + lax.broadcasted_iota(
                jnp.int32, (tile_rows, LANES), 0)
            d_masked = jnp.where(row_ids < rows, d, 0.0)   # loss(0) == 0
            accumulate(loss_of(d_masked))
    else:
        accumulate(loss_of(d))


def wing_loss(pred, target, *, w=10.0, eps=2.0, tile_rows=None, num_cores=None):
    assert pred.shape == target.shape, "pred/target must have the same shape"
    w = float(w)
    eps = float(eps)
    c = w * (1.0 - math.log(1.0 + w / eps))   # trace-time constant
    n = pred.size

    auto_cores, auto_tile = _chip_defaults()
    if num_cores is None:
        num_cores = auto_cores
    if tile_rows is None:
        tile_rows = auto_tile

    pred_f = pred.reshape(-1)
    tgt_f = target.reshape(-1)

    # Pad to whole (16, 128) tiles; zero-diff pads contribute exactly 0 loss.
    pad = (-n) % (ROW_ALIGN * LANES)
    if pad:
        pred_f = jnp.pad(pred_f, (0, pad))
        tgt_f = jnp.pad(tgt_f, (0, pad))
    rows = pred_f.size // LANES
    pred2d = pred_f.reshape(rows, LANES)
    tgt2d = tgt_f.reshape(rows, LANES)

    tile = min(tile_rows, rows)                   # rows is a multiple of 16
    num_blocks = pl.cdiv(rows, tile)
    steps_per_core = pl.cdiv(num_blocks, num_cores)
    # Mask path only needed for a partial last block or clamped duplicates.
    needs_mask = (rows % tile != 0) or (num_cores * steps_per_core > num_blocks)

    def in_index_map(core, step):
        # Clamp so the DMA never starts past the array end; the kernel masks
        # the duplicated tail block using the *logical* index instead.
        return (jnp.minimum(core * steps_per_core + step, num_blocks - 1), 0)

    kernel = functools.partial(
        _wing_loss_kernel,
        w=w, inv_eps=1.0 / eps, c=c,
        rows=rows, num_blocks=num_blocks, steps_per_core=steps_per_core,
        tile_rows=tile, needs_mask=needs_mask,
    )

    block_bytes = tile * LANES * pred2d.dtype.itemsize
    # 2 inputs x 2 pipeline buffers + intermediates, plus headroom; capped so a
    # large tile choice never eats v7x's 64 MiB VMEM.
    vmem_limit = int(min(max(32 << 20, 6 * block_bytes + (8 << 20)), 48 << 20))

    partials = pl.pallas_call(
        kernel,
        out_shape=jax.ShapeDtypeStruct((num_cores, SUBLANES, LANES), jnp.float32),
        grid_spec=pltpu.PrefetchScalarGridSpec(
            num_scalar_prefetch=0,
            grid=(num_cores, steps_per_core),
            in_specs=[
                pl.BlockSpec((tile, LANES), in_index_map),
                pl.BlockSpec((tile, LANES), in_index_map),
            ],
            out_specs=pl.BlockSpec((1, SUBLANES, LANES),
                                   lambda core, step: (core, 0, 0)),
        ),
        compiler_params=pltpu.CompilerParams(
            # TODO(synk): on v7x, confirm in xprof that axis 0 is split across
            # both TensorCores; if not, switch axis 0 to pltpu.CORE_PARALLEL.
            dimension_semantics=("parallel", "arbitrary"),
            vmem_limit_bytes=vmem_limit,
        ),
    )(pred2d, tgt2d)

    total = jnp.sum(partials)
    return (total / jnp.float32(n)).astype(jnp.float32)


def wing_loss_ref(pred, target, w=10.0, eps=2.0):
    # Pure-JAX reference matching the PyTorch module exactly.
    c = w * (1.0 - jnp.log(1.0 + w / eps))
    x = pred - target
    abs_x = jnp.abs(x)
    loss = jnp.where(abs_x < w, w * jnp.log(1.0 + abs_x / eps), abs_x - c)
    return jnp.mean(loss)


if __name__ == "__main__":
    key = jax.random.PRNGKey(0)
    k1, k2 = jax.random.split(key)
    # Scale pred so |pred - target| straddles w=10 and both branches are hit.
    pred = 8.0 * jax.random.normal(k1, (2, 4, 16, 16), dtype=jnp.float32)
    target = jax.random.normal(k2, (2, 4, 16, 16), dtype=jnp.float32)

    out = wing_loss(pred, target, w=10.0, eps=2.0)
    jax.block_until_ready(out)

    ref = wing_loss_ref(pred, target, w=10.0, eps=2.0)
    assert jnp.allclose(out, ref, rtol=1e-4, atol=1e-4), (out, ref)

    print("KERNEL_OK")
</pallas_src>

<mosaic_0001>
module attributes {stable_mosaic.version = 11 : i64} {
  func.func @_wing_loss_kernel(%arg0: i32, %arg1: i32, %arg2: memref<16x128xf32, #tpu.memory_space<vmem>>, %arg3: memref<16x128xf32, #tpu.memory_space<vmem>>, %arg4: memref<1x8x128xf32, #tpu.memory_space<vmem>>) attributes {dimension_semantics = [#tpu.dimension_semantics<parallel>, #tpu.dimension_semantics<arbitrary>], iteration_bounds = array<i64: 1, 1>, scalar_prefetch = 0 : i64, scratch_operands = 0 : i64, tpu.core_type = #tpu.core_type<tc>, window_params = [{transform_indices = @transform_0, window_bounds = array<i64: 16, 128>}, {transform_indices = @transform_1, window_bounds = array<i64: 16, 128>}, {transform_indices = @transform_2, window_bounds = array<i64: 1, 8, 128>}]} {
    %c0_i32 = arith.constant 0 : i32
    %0 = arith.cmpi eq, %arg1, %c0_i32 : i32
    %1 = arith.extui %0 : i1 to i32
    %c0_i32_0 = arith.constant 0 : i32
    %2 = arith.cmpi ne, %1, %c0_i32_0 : i32
    scf.if %2 {
      %cst_15 = arith.constant 0.000000e+00 : f32
      %27 = vector.broadcast %cst_15 : f32 to vector<1x8x128xf32>
      %c0_16 = arith.constant 0 : index
      %c0_17 = arith.constant 0 : index
      %c0_18 = arith.constant 0 : index
      %28 = vector.load %arg4[%c0_16, %c0_17, %c0_18] : memref<1x8x128xf32, #tpu.memory_space<vmem>>, vector<1x8x128xf32>
      tpu.vector_store %arg4[%c0_16, %c0_17, %c0_18], %27 {strides = array<i32>} : memref<1x8x128xf32, #tpu.memory_space<vmem>>, vector<1x8x128xf32>,
    } else {
    }
    %c0 = arith.constant 0 : index
    %c0_1 = arith.constant 0 : index
    %3 = vector.load %arg2[%c0, %c0_1] : memref<16x128xf32, #tpu.memory_space<vmem>>, vector<16x128xf32>
    %c0_2 = arith.constant 0 : index
    %c0_3 = arith.constant 0 : index
    %4 = vector.load %arg3[%c0_2, %c0_3] : memref<16x128xf32, #tpu.memory_space<vmem>>, vector<16x128xf32>
    %5 = arith.subf %3, %4 : vector<16x128xf32>
    %6 = math.absf %5 : vector<16x128xf32>
    %cst = arith.constant 5.000000e-01 : f32
    %7 = vector.broadcast %cst : f32 to vector<16x128xf32>
    %8 = arith.mulf %6, %7 : vector<16x128xf32>
    %cst_4 = arith.constant 1.000000e+00 : f32
    %9 = vector.broadcast %cst_4 : f32 to vector<16x128xf32>
    %10 = arith.addf %9, %8 : vector<16x128xf32>
    %11 = math.log %10 : vector<16x128xf32>
    %cst_5 = arith.constant 1.000000e+01 : f32
    %12 = vector.broadcast %cst_5 : f32 to vector<16x128xf32>
    %13 = arith.mulf %12, %11 : vector<16x128xf32>
    %cst_6 = arith.constant 1.000000e+01 : f32
    %14 = vector.broadcast %cst_6 : f32 to vector<16x128xf32>
    %15 = arith.cmpf olt, %6, %14 : vector<16x128xf32>
    %cst_7 = arith.constant -7.9175949 : f32
    %16 = vector.broadcast %cst_7 : f32 to vector<16x128xf32>
    %17 = arith.subf %6, %16 : vector<16x128xf32>
    %18 = arith.select %15, %13, %17 : vector<16x128xi1>, vector<16x128xf32>
    %19 = vector.shape_cast %18 : vector<16x128xf32> to vector<2x8x128xf32>
    %cst_8 = arith.constant dense<0.000000e+00> : vector<8x128xf32>
    %20 = vector.multi_reduction <add>, %19, %cst_8 [0] : vector<2x8x128xf32> to vector<8x128xf32>
    %c0_9 = arith.constant 0 : index
    %c0_10 = arith.constant 0 : index
    %c0_11 = arith.constant 0 : index
    %21 = vector.load %arg4[%c0_9, %c0_10, %c0_11] : memref<1x8x128xf32, #tpu.memory_space<vmem>>, vector<1x8x128xf32>
    %22 = vector.shape_cast %21 : vector<1x8x128xf32> to vector<8x128xf32>
    %23 = arith.addf %22, %20 : vector<8x128xf32>
    %c0_12 = arith.constant 0 : index
    %c0_13 = arith.constant 0 : index
    %c0_14 = arith.constant 0 : index
    %24 = vector.load %arg4[%c0_12, %c0_13, %c0_14] : memref<1x8x128xf32, #tpu.memory_space<vmem>>, vector<1x8x128xf32>
    %25 = vector.shape_cast %24 : vector<1x8x128xf32> to vector<8x128xf32>
    %26 = vector.shape_cast %23 : vector<8x128xf32> to vector<1x8x128xf32>
    tpu.vector_store %arg4[%c0_12, %c0_13, %c0_14], %26 {strides = array<i32>} : memref<1x8x128xf32, #tpu.memory_space<vmem>>, vector<1x8x128xf32>,
    return
  }
  func.func @transform_0(%arg0: i32, %arg1: i32) -> (i32, i32) {
    %c1_i32 = arith.constant 1 : i32
    %0 = arith.muli %arg0, %c1_i32 : i32
    %1 = arith.addi %0, %arg1 : i32
    %c0_i32 = arith.constant 0 : i32
    %2 = arith.minsi %1, %c0_i32 : i32
    %c0_i32_0 = arith.constant 0 : i32
    %c0_i32_1 = arith.constant 0 : i32
    return %2, %c0_i32_0 : i32, i32
  }
  func.func @transform_1(%arg0: i32, %arg1: i32) -> (i32, i32) {
    %c1_i32 = arith.constant 1 : i32
    %0 = arith.muli %arg0, %c1_i32 : i32
    %1 = arith.addi %0, %arg1 : i32
    %c0_i32 = arith.constant 0 : i32
    %2 = arith.minsi %1, %c0_i32 : i32
    %c0_i32_0 = arith.constant 0 : i32
    %c0_i32_1 = arith.constant 0 : i32
    return %2, %c0_i32_0 : i32, i32
  }
  func.func @transform_2(%arg0: i32, %arg1: i32) -> (i32, i32, i32) {
    %c0_i32 = arith.constant 0 : i32
    %c0_i32_0 = arith.constant 0 : i32
    %c0_i32_1 = arith.constant 0 : i32
    return %arg0, %c0_i32, %c0_i32_0 : i32, i32, i32
  }
}

</mosaic_0001>

<bundles_post_ra>
// kernel: tpu_custom_call.1
= control target key start
LH: loop header
LB: loop body
LE: loop exit
PB: predicated region body
PF: predicated region fallthrough
CT: control target
= control target key end

     0   :  { %7 = vsyncpa [#allocation3], 0  ;;  %s253_s0 = inlined_call_operand.hbm [shape: f32[16,128], index: 0, kind: input, shape index: {}]   ;;  %s254_s1 = inlined_call_operand.hbm [shape: f32[16,128], index: 1, kind: input, shape index: {}]   ;;  %s255_s2 = inlined_call_operand.hbm [shape: f32[1,8,128], index: 2, kind: output, shape index: {}]  }
   0x1   :  { %8 = vsyncpa [#allocation6], 0 }
   0x2   :  { %9 = vsyncpa [#allocation4], 0  ;;  %s197_s9 = smov [#allocation2]   ;;  %s125_s13 = scalar_lea.hbm %s253_s0, 256 }
   0x3   :  { %s21_s10 = sshll.u32 %s197_s9, 4  ;;  %p126_p0 = scmp.ne.s32.totalorder %s253_s0, %s125_s13  ;;  %s22_s10 = int_to_ptr.vmem [resolvable:$true] %s21_s10 }
   0x4   :  { %p129_p1 = scmp.lt.u32.totalorder %s125_s13, %s253_s0 }
   0x6   :  { %p131_p2 = pnand %p129_p1, %p126_p0 }
   0x8   :  { %134 = shalt.err (!%p131_p2)
}
   0x9   :  { %s135_s18 = scalar_lea.vmem %s22_s10, 256  ;;  %p140_p4 = scmp.lt.s32.totalorder %s22_s10, %s22_s10 }
   0xa   :  { %p136_p3 = scmp.ne.s32.totalorder %s22_s10, %s135_s18  ;;  %p141_p5 = scmp.lt.s32.totalorder %s135_s18, %s135_s18 }
   0xc   :  { %p142_p6 = por %p141_p5, %p140_p4 }
   0xe   :  { %p143_p7 = pnand %p142_p6, %p136_p3 }
  0x10   :  { %146 = shalt.err (!%p143_p7)
}
  0x11   :  { %s198_s19 = smov 128   ;;  %s199_s20 = smov 8  }
  0x12   :  { %27 = dma.hbm_to_vmem [thread:$0]  %s253_s0, 256, %s22_s10, [#allocation3], %s198_s19, %s198_s19, %s199_s20  }
  0x13   :  { %s200_s23 = smov [#allocation5]   ;;  %s147_s27 = scalar_lea.hbm %s254_s1, 256 }
  0x14   :  { %s39_s24 = sshll.u32 %s200_s23, 4  ;;  %p148_p8 = scmp.ne.s32.totalorder %s254_s1, %s147_s27  ;;  %s40_s24 = int_to_ptr.vmem [resolvable:$true] %s39_s24 }
  0x15   :  { %p151_p9 = scmp.lt.u32.totalorder %s147_s27, %s254_s1 }
  0x17   :  { %p153_p10 = pnand %p151_p9, %p148_p8 }
  0x19   :  { %156 = shalt.err (!%p153_p10)
}
  0x1a   :  { %s157_s4 = scalar_lea.vmem %s40_s24, 256  ;;  %p162_p12 = scmp.lt.s32.totalorder %s40_s24, %s40_s24 }
  0x1b   :  { %p158_p11 = scmp.ne.s32.totalorder %s40_s24, %s157_s4  ;;  %p163_p13 = scmp.lt.s32.totalorder %s157_s4, %s157_s4 }
  0x1d   :  { %p164_p0 = por %p163_p13, %p162_p12 }
  0x1f   :  { %p165_p1 = pnand %p164_p0, %p158_p11 }
  0x21   :  { %168 = shalt.err (!%p165_p1)
}
  0x22   :  { %45 = dma.hbm_to_vmem [thread:$0]  %s254_s1, 256, %s40_s24, [#allocation6], %s198_s19, %s198_s19, %s199_s20  }
  0x23   :  { %191 = dma.done.wait [#allocation3], 256  }
  0x24   :  { %192 = vsyncadd [#allocation3], 4294967040 }
  0x25   :  { %193 = dma.done.wait [#allocation6], 256  }
  0x26   :  { %194 = vsyncadd [#allocation6], 4294967040  ;;  %v65_v0 = vld [vmem:[#allocation2] sm:$0xff]  ;;  %v66_v1 = vld [vmem:[#allocation2 + $0x8] sm:$0xff]  ;;  %s201_s1 = smov [#allocation7]  }
  0x27   :  { %v67_v2 = vld [vmem:[#allocation5] sm:$0xff]  ;;  %v68_v3 = vld [vmem:[#allocation5 + $0x8] sm:$0xff]  ;;  %s99_s6 = sshll.u32 %s201_s1, 4  ;;  %s100_s6 = int_to_ptr.vmem [resolvable:$true] %s99_s6 }
  0x28   :  { %v69_v4 = vsub.f32 %v65_v0, %v67_v2  ;;  %v70_v5 = vsub.f32 %v66_v1, %v68_v3  ;;  %s169_s7 = scalar_lea.vmem %s100_s6, 128  ;;  %p174_p3 = scmp.lt.s32.totalorder %s100_s6, %s100_s6 }
  0x29   :  { %p170_p2 = scmp.ne.s32.totalorder %s100_s6, %s169_s7  ;;  %p175_p4 = scmp.lt.s32.totalorder %s169_s7, %s169_s7 }
  0x2a   :  { %v71_v6 = vand.u32 2147483647, %v69_v4  ;;  %v72_v7 = vand.u32 2147483647, %v70_v5 }
  0x2b   :  { %p176_p5 = por %p175_p4, %p174_p3 }
  0x2c   :  { %v73_v8 = vmul.f32 0.5, %v71_v6  ;;  %v74_v9 = vmul.f32 0.5, %v72_v7  ;;  %v113_v15 = vadd.f32 7.917595, %v71_v6  ;;  %vm83_vm0 = vcmp.lt.f32.partialorder %v71_v6, 10.0 }
  0x2d   :  { %v114_v17 = vadd.f32 7.917595, %v72_v7  ;;  %vm84_vm1 = vcmp.lt.f32.partialorder %v72_v7, 10.0  ;;  %p177_p6 = pnand %p176_p5, %p170_p2 }
  0x2e   :  { %v75_v10 = vadd.f32 1.0, %v73_v8  ;;  %v76_v11 = vadd.f32 1.0, %v74_v9 }
  0x30   :  { %121 = vlog2.f32 %v75_v10 }
  0x31   :  { %123 = vlog2.f32 %v76_v11 }
  0x3a   :  { %v122_v12 = vpop.eup %121 }
  0x3b   :  { %v124_v13 = vpop.eup %123  ;;  %v78_v14 = vmul.f32 0.6931472, %v122_v12 }
  0x3c   :  { %v80_v16 = vmul.f32 0.6931472, %v124_v13 }
  0x3d   :  { %v81_v18 = vmul.f32 10.0, %v78_v14 }
  0x3e   :  { %v82_v19 = vmul.f32 10.0, %v80_v16 }
  0x3f   :  { %v87_v20 = vsel %vm83_vm0, %v81_v18, %v113_v15 }
  0x40   :  { %v88_v21 = vsel %vm84_vm1, %v82_v19, %v114_v17 }
  0x41   :  { %v89_v22 = vadd.f32 %v88_v21, %v87_v20 }
  0x43   :  { %92 = vst [vmem:[#allocation7] sm:$0xff] %v89_v22 }
  0x44   :  { %180 = shalt.err (!%p177_p6)
}
  0x45   :  { %s181_s10 = scalar_lea.hbm %s255_s2, 128 }
  0x46   :  { %p182_p7 = scmp.ne.s32.totalorder %s255_s2, %s181_s10  ;;  %p185_p8 = scmp.lt.u32.totalorder %s181_s10, %s255_s2 }
  0x48   :  { %p187_p9 = pnand %p185_p8, %p182_p7 }
  0x4a   :  { %190 = shalt.err (!%p187_p9)
}
  0x4b   :  { %102 = dma.vmem_to_hbm [thread:$0]  %s100_s6, 128, %s255_s2, [#allocation4]  }
  0x4c   :  { %195 = dma.done.wait [#allocation4], 128  }
  0x4d   :  { %196 = vsyncadd [#allocation4], 4294967168 }
  0x4e   :  { %106 = vsyncpa [#allocation3], 1 }
  0x4f   :  { %107 = vsyncpa [#allocation6], 1 }
  0x50   :  { %108 = vsyncpa [#allocation4], 1 }

</bundles_post_ra>
